<compile_context>
chip_gen: v5e
topology: v5e:2x2
jax: 0.10.0
libtpu: 0.0.40
codegen_flags: <defaults>
</compile_context>

<pallas_src>
import functools

import jax
import jax.numpy as jnp
from jax.experimental import pallas as pl
from jax.experimental.pallas import tpu as pltpu


def _round_up(x: int, m: int) -> int:
    return ((x + m - 1) // m) * m


def feedforward_kernel(x_ref, w1_ref, b1_ref, w2_ref, b2_ref, o_ref):
    # x_ref:  (TM, Dp)   token tile x emb_dim (padded to lanes)
    # w1_ref: (Dp, Hp)   resident in VMEM
    # b1_ref: (1,  Hp)
    # w2_ref: (Hp, Dp)   resident in VMEM
    # b2_ref: (1,  Dp)
    # o_ref:  (TM, Dp)

    # First linear: MXU matmul in the storage dtype, f32 accumulation.
    h = jnp.dot(x_ref[...], w1_ref[...], preferred_element_type=jnp.float32)
    h = h + b1_ref[...].astype(jnp.float32)

    # GELU (tanh approximation), exactly as the PyTorch module:
    # 0.5 * x * (1 + tanh(sqrt(2/pi) * (x + 0.044715 * x^3)))
    c = jnp.float32(0.7978845608028654)  # sqrt(2/pi)
    h = 0.5 * h * (1.0 + jnp.tanh(c * (h + 0.044715 * h * h * h)))

    # Second linear: downcast the (TM, Hp) intermediate to the weight dtype
    # (no-op for f32 params, halves footprint / doubles MXU rate for bf16),
    # accumulate in f32.
    h = h.astype(w2_ref.dtype)
    out = jnp.dot(h, w2_ref[...], preferred_element_type=jnp.float32)
    out = out + b2_ref[...].astype(jnp.float32)

    o_ref[...] = out.astype(o_ref.dtype)


def feedforward(x, w1, b1, w2, b2, *, tm: int = 256):
    """x: (B, S, D); w1: (D, H); b1: (1, H); w2: (H, D); b2: (1, D).

    Returns (B, S, D).
    """
    B, S, D = x.shape
    H = w1.shape[1]
    M = B * S
    x2d = x.reshape(M, D)

    # Pad feature dims to the 128-lane width (lane-dense loads/stores) and the
    # token dim to the tile size so every block is (8,128)-aligned.
    Dp = _round_up(D, 128)
    Hp = _round_up(H, 128)
    TM = tm if M >= tm else _round_up(M, 8)
    Mp = _round_up(M, TM)

    if (Mp, Dp) != (M, D):
        x2d = jnp.pad(x2d, ((0, Mp - M), (0, Dp - D)))
    if (Dp, Hp) != (D, H):
        w1 = jnp.pad(w1, ((0, Dp - D), (0, Hp - H)))
        b1 = jnp.pad(b1, ((0, 0), (0, Hp - H)))
        w2 = jnp.pad(w2, ((0, Hp - H), (0, Dp - D)))
        b2 = jnp.pad(b2, ((0, 0), (0, Dp - D)))

    grid = (Mp // TM,)

    out2d = pl.pallas_call(
        feedforward_kernel,
        out_shape=jax.ShapeDtypeStruct((Mp, Dp), x.dtype),
        grid_spec=pltpu.PrefetchScalarGridSpec(
            num_scalar_prefetch=0,
            grid=grid,
            in_specs=[
                # Activations: streamed, one token tile per grid step.
                pl.BlockSpec((TM, Dp), lambda i: (i, 0)),
                # Weights / biases: constant block index -> resident in VMEM,
                # DMA'd only once across the whole grid.
                pl.BlockSpec((Dp, Hp), lambda i: (0, 0)),
                pl.BlockSpec((1, Hp), lambda i: (0, 0)),
                pl.BlockSpec((Hp, Dp), lambda i: (0, 0)),
                pl.BlockSpec((1, Dp), lambda i: (0, 0)),
            ],
            out_specs=pl.BlockSpec((TM, Dp), lambda i: (i, 0)),
        ),
        compiler_params=pltpu.CompilerParams(
            # Each grid step writes an independent output tile -> parallel
            # (lets v7x shard the token axis across its 2 TensorCores).
            dimension_semantics=("parallel",),
            # Above the 16/32 MiB scoped default, below v7x's 64 MiB physical.
            vmem_limit_bytes=56 * 1024 * 1024,
        ),
    )(x2d, w1, b1, w2, b2)

    return out2d[:M, :D].reshape(B, S, D)


def reference_feedforward(x, w1, b1, w2, b2):
    h = jnp.einsum("bsd,dh->bsh", x, w1) + b1[0]
    c = jnp.float32(0.7978845608028654)
    h = 0.5 * h * (1.0 + jnp.tanh(c * (h + 0.044715 * h ** 3)))
    return jnp.einsum("bsh,hd->bsd", h, w2) + b2[0]


if __name__ == "__main__":
    # cfg = {'emb_dim': 32}  ->  Linear(32, 128), GELU, Linear(128, 32)
    B, S, D = 2, 8, 32
    H = 4 * D

    key = jax.random.PRNGKey(0)
    kx, kw1, kb1, kw2, kb2 = jax.random.split(key, 5)

    x = jax.random.normal(kx, (B, S, D), dtype=jnp.float32)
    # Deterministic synthetic parameters; weights stored (in, out).
    w1 = jax.random.normal(kw1, (D, H), dtype=jnp.float32) * 0.02
    b1 = jax.random.normal(kb1, (1, H), dtype=jnp.float32) * 0.01
    w2 = jax.random.normal(kw2, (H, D), dtype=jnp.float32) * 0.02
    b2 = jax.random.normal(kb2, (1, D), dtype=jnp.float32) * 0.01

    ff = jax.jit(functools.partial(feedforward, tm=256))
    out = ff(x, w1, b1, w2, b2)
    jax.block_until_ready(out)

    ref = reference_feedforward(x, w1, b1, w2, b2)
    assert out.shape == (B, S, D)
    assert jnp.allclose(out, ref, atol=1e-5, rtol=1e-5)

    print("KERNEL_OK")
</pallas_src>

<mosaic_0001>
module attributes {stable_mosaic.version = 11 : i64} {
  func.func @feedforward_kernel(%arg0: i32, %arg1: memref<16x128xf32, #tpu.memory_space<vmem>>, %arg2: memref<128x128xf32, #tpu.memory_space<vmem>>, %arg3: memref<1x128xf32, #tpu.memory_space<vmem>>, %arg4: memref<128x128xf32, #tpu.memory_space<vmem>>, %arg5: memref<1x128xf32, #tpu.memory_space<vmem>>, %arg6: memref<16x128xf32, #tpu.memory_space<vmem>>) attributes {dimension_semantics = [#tpu.dimension_semantics<parallel>], iteration_bounds = array<i64: 1>, scalar_prefetch = 0 : i64, scratch_operands = 0 : i64, tpu.core_type = #tpu.core_type<tc>, window_params = [{transform_indices = @transform_0, window_bounds = array<i64: 16, 128>}, {pipeline_mode = #tpu.pipeline_mode<synchronous>, transform_indices = @transform_1, window_bounds = array<i64: 128, 128>}, {pipeline_mode = #tpu.pipeline_mode<synchronous>, transform_indices = @transform_2, window_bounds = array<i64: 1, 128>}, {pipeline_mode = #tpu.pipeline_mode<synchronous>, transform_indices = @transform_3, window_bounds = array<i64: 128, 128>}, {pipeline_mode = #tpu.pipeline_mode<synchronous>, transform_indices = @transform_4, window_bounds = array<i64: 1, 128>}, {transform_indices = @transform_5, window_bounds = array<i64: 16, 128>}]} {
    %c0 = arith.constant 0 : index
    %c0_0 = arith.constant 0 : index
    %0 = vector.load %arg1[%c0, %c0_0] : memref<16x128xf32, #tpu.memory_space<vmem>>, vector<16x128xf32>
    %c0_1 = arith.constant 0 : index
    %c0_2 = arith.constant 0 : index
    %1 = vector.load %arg2[%c0_1, %c0_2] : memref<128x128xf32, #tpu.memory_space<vmem>>, vector<128x128xf32>
    %cst = arith.constant dense<0.000000e+00> : vector<16x128xf32>
    %2 = tpu.matmul %0, %1, %cst {dimension_numbers = #tpu.dot_dimension_numbers<[1], [0], [0], [1], [0, 0, 1, 1], [], []>} : vector<16x128xf32>, vector<128x128xf32>, vector<16x128xf32> -> vector<16x128xf32>
    %c0_3 = arith.constant 0 : index
    %c0_4 = arith.constant 0 : index
    %3 = vector.load %arg3[%c0_3, %c0_4] : memref<1x128xf32, #tpu.memory_space<vmem>>, vector<1x128xf32>
    %4 = vector.broadcast %3 : vector<1x128xf32> to vector<16x128xf32>
    %5 = arith.addf %2, %4 : vector<16x128xf32>
    %cst_5 = arith.constant 5.000000e-01 : f32
    %6 = vector.broadcast %cst_5 : f32 to vector<16x128xf32>
    %7 = arith.mulf %6, %5 : vector<16x128xf32>
    %cst_6 = arith.constant 4.471500e-02 : f32
    %8 = vector.broadcast %cst_6 : f32 to vector<16x128xf32>
    %9 = arith.mulf %8, %5 : vector<16x128xf32>
    %10 = arith.mulf %9, %5 : vector<16x128xf32>
    %11 = arith.mulf %10, %5 : vector<16x128xf32>
    %12 = arith.addf %5, %11 : vector<16x128xf32>
    %cst_7 = arith.constant 0.797884583 : f32
    %13 = vector.broadcast %cst_7 : f32 to vector<16x128xf32>
    %14 = arith.mulf %13, %12 : vector<16x128xf32>
    %15 = math.tanh %14 : vector<16x128xf32>
    %cst_8 = arith.constant 1.000000e+00 : f32
    %16 = vector.broadcast %cst_8 : f32 to vector<16x128xf32>
    %17 = arith.addf %16, %15 : vector<16x128xf32>
    %18 = arith.mulf %7, %17 : vector<16x128xf32>
    %c0_9 = arith.constant 0 : index
    %c0_10 = arith.constant 0 : index
    %19 = vector.load %arg4[%c0_9, %c0_10] : memref<128x128xf32, #tpu.memory_space<vmem>>, vector<128x128xf32>
    %cst_11 = arith.constant dense<0.000000e+00> : vector<16x128xf32>
    %20 = tpu.matmul %18, %19, %cst_11 {dimension_numbers = #tpu.dot_dimension_numbers<[1], [0], [0], [1], [0, 0, 1, 1], [], []>} : vector<16x128xf32>, vector<128x128xf32>, vector<16x128xf32> -> vector<16x128xf32>
    %c0_12 = arith.constant 0 : index
    %c0_13 = arith.constant 0 : index
    %21 = vector.load %arg5[%c0_12, %c0_13] : memref<1x128xf32, #tpu.memory_space<vmem>>, vector<1x128xf32>
    %22 = vector.broadcast %21 : vector<1x128xf32> to vector<16x128xf32>
    %23 = arith.addf %20, %22 : vector<16x128xf32>
    %c0_14 = arith.constant 0 : index
    %c0_15 = arith.constant 0 : index
    %24 = vector.load %arg6[%c0_14, %c0_15] : memref<16x128xf32, #tpu.memory_space<vmem>>, vector<16x128xf32>
    tpu.vector_store %arg6[%c0_14, %c0_15], %23 {strides = array<i32>} : memref<16x128xf32, #tpu.memory_space<vmem>>, vector<16x128xf32>,
    return
  }
  func.func @transform_0(%arg0: i32) -> (i32, i32) {
    %c0_i32 = arith.constant 0 : i32
    %c0_i32_0 = arith.constant 0 : i32
    return %arg0, %c0_i32 : i32, i32
  }
  func.func @transform_1(%arg0: i32) -> (i32, i32) {
    %c0_i32 = arith.constant 0 : i32
    %c0_i32_0 = arith.constant 0 : i32
    %c0_i32_1 = arith.constant 0 : i32
    return %c0_i32, %c0_i32_0 : i32, i32
  }
  func.func @transform_2(%arg0: i32) -> (i32, i32) {
    %c0_i32 = arith.constant 0 : i32
    %c0_i32_0 = arith.constant 0 : i32
    %c0_i32_1 = arith.constant 0 : i32
    return %c0_i32, %c0_i32_0 : i32, i32
  }
  func.func @transform_3(%arg0: i32) -> (i32, i32) {
    %c0_i32 = arith.constant 0 : i32
    %c0_i32_0 = arith.constant 0 : i32
    %c0_i32_1 = arith.constant 0 : i32
    return %c0_i32, %c0_i32_0 : i32, i32
  }
  func.func @transform_4(%arg0: i32) -> (i32, i32) {
    %c0_i32 = arith.constant 0 : i32
    %c0_i32_0 = arith.constant 0 : i32
    %c0_i32_1 = arith.constant 0 : i32
    return %c0_i32, %c0_i32_0 : i32, i32
  }
  func.func @transform_5(%arg0: i32) -> (i32, i32) {
    %c0_i32 = arith.constant 0 : i32
    %c0_i32_0 = arith.constant 0 : i32
    return %arg0, %c0_i32 : i32, i32
  }
}

</mosaic_0001>

<bundles_post_ra>
// kernel: feedforward.1
= control target key start
LH: loop header
LB: loop body
LE: loop exit
PB: predicated region body
PF: predicated region fallthrough
CT: control target
= control target key end

     0   :  { %s314_s1 = inlined_call_operand.vmem [shape: f32[128,128], index: 1, kind: input, shape index: {}]   ;;  %s315_s3 = inlined_call_operand.vmem [shape: f32[128,128], index: 3, kind: input, shape index: {}]   ;;  %s316_s2 = inlined_call_operand.vmem [shape: f32[1,128], index: 2, kind: input, shape index: {}]   ;;  %s317_s0 = inlined_call_operand.vmem [shape: f32[16,128], index: 0, kind: input, shape index: {}]   ;;  %s318_s4 = inlined_call_operand.vmem [shape: f32[1,128], index: 4, kind: input, shape index: {}]   ;;  %s319_s5 = inlined_call_operand.vmem [shape: f32[16,128], index: 5, kind: output, shape index: {}]  }
   0x1   :  { %v37_v0 = vld [vmem:[%s314_s1 + $0x78] sm:$0xff]  ;;  %v36_v1 = vld [vmem:[%s314_s1 + $0x70] sm:$0xff]  ;;  %v35_v2 = vld [vmem:[%s314_s1 + $0x68] sm:$0xff] }
   0x2   :  { %42 = vmatpush.msra.mxu0 %v37_v0  ;;  %132 = vmatpush.msra.mxu2 %v37_v0  ;;  %v34_v3 = vld [vmem:[%s314_s1 + $0x60] sm:$0xff]  ;;  %v33_v4 = vld [vmem:[%s314_s1 + $0x58] sm:$0xff]  ;;  %v97_v6 = vld [vmem:[%s315_s3 + $0x70] sm:$0xff] }
   0x3   :  { %v98_v5 = vld [vmem:[%s315_s3 + $0x78] sm:$0xff]  ;;  %v32_v7 = vld [vmem:[%s314_s1 + $0x50] sm:$0xff]  ;;  %v96_v8 = vld [vmem:[%s315_s3 + $0x68] sm:$0xff] }
   0x4   :  { %43 = vmatpush.msra.mxu0 %v36_v1  ;;  %133 = vmatpush.msra.mxu2 %v36_v1  ;;  %v31_v9 = vld [vmem:[%s314_s1 + $0x48] sm:$0xff]  ;;  %v95_v10 = vld [vmem:[%s315_s3 + $0x60] sm:$0xff]  ;;  %v29_v12 = vld [vmem:[%s314_s1 + $0x38] sm:$0xff] }
   0x5   :  { %103 = vmatpush.msra.mxu1 %v98_v5  ;;  %148 = vmatpush.msra.mxu3 %v98_v5  ;;  %v30_v11 = vld [vmem:[%s314_s1 + $0x40] sm:$0xff]  ;;  %v28_v13 = vld [vmem:[%s314_s1 + $0x30] sm:$0xff]  ;;  %v27_v14 = vld [vmem:[%s314_s1 + $0x28] sm:$0xff] }
   0x6   :  { %44 = vmatpush.msra.mxu0 %v35_v2  ;;  %134 = vmatpush.msra.mxu2 %v35_v2  ;;  %v26_v15 = vld [vmem:[%s314_s1 + $0x20] sm:$0xff]  ;;  %v25_v16 = vld [vmem:[%s314_s1 + $0x18] sm:$0xff]  ;;  %v24_v17 = vld [vmem:[%s314_s1 + $0x10] sm:$0xff] }
   0x7   :  { %104 = vmatpush.msra.mxu1 %v97_v6  ;;  %149 = vmatpush.msra.mxu3 %v97_v6  ;;  %v23_v18 = vld [vmem:[%s314_s1 + $0x8] sm:$0xff]  ;;  %v22_v19 = vld [vmem:[%s314_s1] sm:$0xff]  ;;  %v94_v22 = vld [vmem:[%s315_s3 + $0x58] sm:$0xff] }
   0x8   :  { %45 = vmatpush.msra.mxu0 %v34_v3  ;;  %135 = vmatpush.msra.mxu2 %v34_v3  ;;  %v20_v20 = vld [vmem:[%s317_s0] sm:$0xff]  ;;  %v21_v21 = vld [vmem:[%s317_s0 + $0x8] sm:$0xff]  ;;  %v93_v23 = vld [vmem:[%s315_s3 + $0x50] sm:$0xff] }
   0x9   :  { %105 = vmatpush.msra.mxu1 %v96_v8  ;;  %150 = vmatpush.msra.mxu3 %v96_v8  ;;  %v92_v24 = vld [vmem:[%s315_s3 + $0x48] sm:$0xff]  ;;  %v91_v25 = vld [vmem:[%s315_s3 + $0x40] sm:$0xff]  ;;  %v90_v26 = vld [vmem:[%s315_s3 + $0x38] sm:$0xff] }
   0xa   :  { %46 = vmatpush.msra.mxu0 %v33_v4  ;;  %136 = vmatpush.msra.mxu2 %v33_v4  ;;  %v89_v27 = vld [vmem:[%s315_s3 + $0x30] sm:$0xff]  ;;  %v88_v28 = vld [vmem:[%s315_s3 + $0x28] sm:$0xff]  ;;  %v87_v29 = vld [vmem:[%s315_s3 + $0x20] sm:$0xff] }
   0xb   :  { %106 = vmatpush.msra.mxu1 %v95_v10  ;;  %151 = vmatpush.msra.mxu3 %v95_v10  ;;  %v86_v30 = vld [vmem:[%s315_s3 + $0x18] sm:$0xff]  ;;  %v85_v31 = vld [vmem:[%s315_s3 + $0x10] sm:$0xff]  ;;  %v84_v32 = vld [vmem:[%s315_s3 + $0x8] sm:$0xff] }
   0xc   :  { %47 = vmatpush.msra.mxu0 %v32_v7  ;;  %137 = vmatpush.msra.mxu2 %v32_v7  ;;  %v83_v33 = vld [vmem:[%s315_s3] sm:$0xff] }
   0xd   :  { %107 = vmatpush.msra.mxu1 %v94_v22  ;;  %152 = vmatpush.msra.mxu3 %v94_v22  ;;  %v164_v34 = vld [vmem:[%s316_s2] ss:$0 sm:$0xff] }
   0xe   :  { %48 = vmatpush.msra.mxu0 %v31_v9  ;;  %138 = vmatpush.msra.mxu2 %v31_v9  ;;  %v165_v57 = vld [vmem:[%s318_s4] ss:$0 sm:$0xff] }
   0xf   :  { %108 = vmatpush.msra.mxu1 %v93_v23  ;;  %153 = vmatpush.msra.mxu3 %v93_v23 }
  0x10   :  { %49 = vmatpush.msra.mxu0 %v30_v11  ;;  %139 = vmatpush.msra.mxu2 %v30_v11 }
  0x11   :  { %109 = vmatpush.msra.mxu1 %v92_v24  ;;  %154 = vmatpush.msra.mxu3 %v92_v24 }
  0x12   :  { %50 = vmatpush.msra.mxu0 %v29_v12  ;;  %140 = vmatpush.msra.mxu2 %v29_v12 }
  0x13   :  { %110 = vmatpush.msra.mxu1 %v91_v25  ;;  %155 = vmatpush.msra.mxu3 %v91_v25 }
  0x14   :  { %51 = vmatpush.msra.mxu0 %v28_v13  ;;  %141 = vmatpush.msra.mxu2 %v28_v13 }
  0x15   :  { %111 = vmatpush.msra.mxu1 %v90_v26  ;;  %156 = vmatpush.msra.mxu3 %v90_v26 }
  0x16   :  { %52 = vmatpush.msra.mxu0 %v27_v14  ;;  %142 = vmatpush.msra.mxu2 %v27_v14 }
  0x17   :  { %112 = vmatpush.msra.mxu1 %v89_v27  ;;  %157 = vmatpush.msra.mxu3 %v89_v27 }
  0x18   :  { %53 = vmatpush.msra.mxu0 %v26_v15  ;;  %143 = vmatpush.msra.mxu2 %v26_v15 }
  0x19   :  { %113 = vmatpush.msra.mxu1 %v88_v28  ;;  %158 = vmatpush.msra.mxu3 %v88_v28 }
  0x1a   :  { %54 = vmatpush.msra.mxu0 %v25_v16  ;;  %144 = vmatpush.msra.mxu2 %v25_v16 }
  0x1b   :  { %114 = vmatpush.msra.mxu1 %v87_v29  ;;  %159 = vmatpush.msra.mxu3 %v87_v29 }
  0x1c   :  { %55 = vmatpush.msra.mxu0 %v24_v17  ;;  %145 = vmatpush.msra.mxu2 %v24_v17 }
  0x1d   :  { %115 = vmatpush.msra.mxu1 %v86_v30  ;;  %160 = vmatpush.msra.mxu3 %v86_v30 }
  0x1e   :  { %56 = vmatpush.msra.mxu0 %v23_v18  ;;  %146 = vmatpush.msra.mxu2 %v23_v18 }
  0x1f   :  { %116 = vmatpush.msra.mxu1 %v85_v31  ;;  %161 = vmatpush.msra.mxu3 %v85_v31 }
  0x20   :  { %57 = vmatpush.msra.mxu0 %v22_v19  ;;  %147 = vmatpush.msra.mxu2 %v22_v19 }
  0x21   :  { %58 = vmatmul.f32.vlgmr.msra.gmra.mxu0 %v20_v20  ;;  %61 = vmatmul.f32.vlgmr.msra.gmra.mxu2 %v21_v21 }
  0x22   :  { %117 = vmatpush.msra.mxu1 %v84_v32  ;;  %162 = vmatpush.msra.mxu3 %v84_v32 }
  0x24   :  { %118 = vmatpush.msra.mxu1 %v83_v33  ;;  %163 = vmatpush.msra.mxu3 %v83_v33 }
  0x9e   :  { %v59_v35 = vpop.f32.mrf.mxu0 }
  0x9f   :  { %v60_v36 = vadd.f32 %v164_v34, %v59_v35 }
  0xa1   :  { %v67_v37 = vmul.f32 0.044715, %v60_v36  ;;  %v65_v50 = vmul.f32 0.5, %v60_v36 }
  0xa3   :  { %v69_v38 = vmul.f32 %v67_v37, %v60_v36 }
  0xa4   :  { %v62_v39 = vpop.f32.mrf.mxu2 }
  0xa5   :  { %v63_v40 = vadd.f32 %v164_v34, %v62_v39  ;;  %v71_v41 = vmul.f32 %v69_v38, %v60_v36 }
  0xa7   :  { %v73_v42 = vadd.f32 %v71_v41, %v60_v36  ;;  %v68_v43 = vmul.f32 0.044715, %v63_v40  ;;  %v66_v54 = vmul.f32 0.5, %v63_v40 }
  0xa9   :  { %v75_v44 = vmul.f32 0.7978846, %v73_v42  ;;  %v70_v45 = vmul.f32 %v68_v43, %v63_v40 }
  0xab   :  { %166 = vtanh.f32 %v75_v44  ;;  %v72_v46 = vmul.f32 %v70_v45, %v63_v40 }
  0xad   :  { %v74_v47 = vadd.f32 %v72_v46, %v63_v40 }
  0xaf   :  { %v76_v48 = vmul.f32 0.7978846, %v74_v47 }
  0xb1   :  { %v167_v49 = vpop.eup %166  ;;  %168 = vtanh.f32 %v76_v48 }
  0xb2   :  { %v79_v51 = vadd.f32 1.0, %v167_v49 }
  0xb4   :  { %v81_v52 = vmul.f32 %v79_v51, %v65_v50 }
  0xb6   :  { %119 = vmatmul.f32.vlgmr.msra.gmra.mxu1 %v81_v52 }
  0xb7   :  { %v169_v53 = vpop.eup %168 }
  0xb8   :  { %v80_v55 = vadd.f32 1.0, %v169_v53 }
  0xba   :  { %v82_v56 = vmul.f32 %v80_v55, %v66_v54 }
  0xbc   :  { %122 = vmatmul.f32.vlgmr.msra.gmra.mxu3 %v82_v56 }
 0x133   :  { %v120_v58 = vpop.f32.mrf.mxu1 }
 0x134   :  { %v121_v59 = vadd.f32 %v165_v57, %v120_v58 }
 0x136   :  { %126 = vst [vmem:[%s319_s5] sm:$0xff] %v121_v59 }
 0x13f   :  { %v123_v60 = vpop.f32.mrf.mxu3 }
 0x140   :  { %v124_v61 = vadd.f32 %v165_v57, %v123_v60 }
 0x142   :  { %127 = vst [vmem:[%s319_s5 + $0x8] sm:$0xff] %v124_v61 }

</bundles_post_ra>
